<compile_context>
chip_gen: v7x
topology: tpu7x:2x2x1
jax: 0.10.0
libtpu: 0.0.40
codegen_flags: <defaults>
</compile_context>

<pallas_src>
import math

import jax
import jax.numpy as jnp
from jax.experimental import pallas as pl
from jax.experimental.pallas import tpu as pltpu


def gp_attention_kernel(q_ref, x_ref, mask_ref, enc_ref,
                        wkv_ref, bkv_ref, wd_ref, bd_ref,
                        gamma_ref, beta_ref, out_ref):
    """Fused GPAttention forward for one (Bb,)-batch block.

    q_ref      : (Bb, 1, H)  f32   pre-projected query (user_emb @ Wq + bq, hoisted)
    x_ref      : (Bb, P, H)  f32   flattened input_tensor (residual / LayerNorm path)
    mask_ref   : (Bb, P, K)  f32   additive attention mask (assumed <= 0)
    enc_ref    : (P, K)      int32 gather indices into the P flat positions
    wkv_ref    : (H, 2H)     bf16  fused [Wk | Wv]  (stored (in, out) == torch weight^T)
    bkv_ref    : (1, 2H)     f32   fused [bk | bv]
    wd_ref     : (H, H)      bf16
    bd_ref     : (1, H)      f32
    gamma/beta : (1, H)      f32   TF-style LayerNorm weight / bias
    out_ref    : (Bb, P, H)  f32
    """
    Bb, P, H = x_ref.shape
    K = mask_ref.shape[2]

    x3 = x_ref[...]                                   # (Bb, P, H) f32 residual path
    x2 = x3.reshape(Bb * P, H)                        # sublane-tile aligned (P % 8 == 0)
    x_b = x2.astype(jnp.bfloat16)

    # --- fused K|V projection: one (Bb*P, H) @ (H, 2H) MXU pass ---
    kv = jnp.dot(x_b, wkv_ref[...],
                 preferred_element_type=jnp.float32) + bkv_ref[...]   # (Bb*P, 2H)
    k3 = kv[:, :H].reshape(Bb, P, H).astype(jnp.bfloat16)             # (Bb, P, H)
    v3 = kv[:, H:].reshape(Bb, P, H).astype(jnp.bfloat16)             # (Bb, P, H)

    # --- all P scores with one batched matvec: s[b, p] = q[b] . k[b, p] / sqrt(H) ---
    scale = 1.0 / math.sqrt(float(H))
    q_b = q_ref[...].astype(jnp.bfloat16)                             # (Bb, 1, H)
    s3 = jnp.einsum('bqh,bph->bqp', q_b, k3,
                    preferred_element_type=jnp.float32) * scale       # (Bb, 1, P)

    # --- single-pass gather + softmax folded into one (Bb, P, P) combination matrix ---
    # softmax_k(s[enc_k] + mask_k) == (exp(s - M)[enc_k] * exp(mask_k)) / denom
    # with M = per-batch max over all P scores (shift cancels in the division).
    # Valid because the additive mask is <= 0; the mask is clamped at -30 so a
    # fully-masked row degrades to softmax over its raw slot scores (matching
    # the reference's fancy-indexed softmax) instead of producing 0/0 NaNs.
    m = jnp.max(s3, axis=-1, keepdims=True)                           # (Bb, 1, 1)
    e_row = jnp.exp(s3 - m)                                           # (Bb, 1, P)  EUP
    em = jnp.exp(jnp.maximum(mask_ref[...], -30.0))                   # (Bb, P, K)  EUP
    col = jax.lax.broadcasted_iota(jnp.int32, (P, P), 1)              # col[p, j] = j
    enc = enc_ref[...]                                                # (P, K) int32

    # NOTE: encoder_index values are assumed in [0, P); out-of-range slots drop out.
    w_un = jnp.zeros((Bb, P, P), jnp.float32)
    for kk in range(K):                                # ONE fused K loop, VPU only
        hit = (col == enc[:, kk:kk + 1])[None, :, :]                  # (1, P, P) bool
        w_un = w_un + jnp.where(hit, e_row, 0.0) * em[:, :, kk:kk + 1]
    denom = jnp.sum(w_un, axis=-1, keepdims=True)      # the single cross-lane reduce
    w = w_un * pl.reciprocal(jnp.maximum(denom, 1e-30), approx=True)  # EUP recip
    # TODO(synk): attn_dropout / out_dropout are identity here (eval-mode forward).

    # --- probability-weighted values: one batched (P, P) @ (P, H) matmul ---
    ctx = jnp.einsum('bpq,bqh->bph', w.astype(jnp.bfloat16), v3,
                     preferred_element_type=jnp.float32)              # (Bb, P, H)
    # TODO(synk): at production P, tile this stage in (tP, P) row slabs so the
    # (Bb, P, P) matrix never has to be fully resident (v7x has only 64 MiB VMEM).

    # --- output dense + residual + TF-style LayerNorm (eps INSIDE the sqrt) ---
    h = jnp.dot(ctx.reshape(Bb * P, H).astype(jnp.bfloat16), wd_ref[...],
                preferred_element_type=jnp.float32) + bd_ref[...]     # (Bb*P, H)
    h = h + x2
    mu = jnp.mean(h, axis=-1, keepdims=True)
    c = h - mu
    var = jnp.mean(c * c, axis=-1, keepdims=True)
    normed = c * jax.lax.rsqrt(var + 1e-12)                           # EUP rsqrt
    y = gamma_ref[...] * normed + beta_ref[...]
    # TODO(synk): with H=32 this store is lane-sparse (32/128 lanes); pad H to a
    # multiple of 128 (or emit bf16) at production sizes for a dense vst.
    out_ref[...] = y.reshape(Bb, P, H).astype(out_ref.dtype)


def gp_attention(user_emb, input_tensor, attention_mask, encoder_index, params,
                 *, batch_block=None):
    """Wrapper: hoisted Q projection, dtype/layout glue, one Pallas call over batch blocks."""
    B, N, S, H = input_tensor.shape
    P, K = encoder_index.shape
    assert P == N * S
    assert P % 8 == 0, "P must be a multiple of 8 for the in-kernel (Bb*P, H) reshape"

    wq, bq, wk, bk, wv, bv, wd, bd, gamma, beta = params

    # --- hoisted query projection (plain XLA, f32): 1-row matvecs waste the MXU ---
    q = (user_emb.astype(jnp.float32) @ wq.astype(jnp.float32)
         + bq.astype(jnp.float32)).reshape(B, 1, H)

    x_flat = input_tensor.reshape(B, P, H).astype(jnp.float32)
    mask = attention_mask.astype(jnp.float32)
    enc_idx = encoder_index.astype(jnp.int32)

    # bf16 MXU weights; fuse K|V projections into one (H, 2H) matmul.
    wkv_b = jnp.concatenate([wk, wv], axis=-1).astype(jnp.bfloat16)   # (H, 2H)
    bkv = jnp.concatenate([bk, bv], axis=-1).astype(jnp.float32)      # (1, 2H)
    wd_b = wd.astype(jnp.bfloat16)
    bd_f = bd.astype(jnp.float32)
    gamma_f = gamma.astype(jnp.float32)
    beta_f = beta.astype(jnp.float32)

    # --- batch block: fill the MXU sublane dim (target >= 256 rows) under a
    # conservative working-set budget that fits v7x's 64 MiB VMEM as well. ---
    def _step_bytes(bb):
        io_blocks = 4 * bb * P * (2 * H + K)        # x + out + mask blocks (f32)
        w_mat = 4 * bb * P * P                      # (Bb, P, P) combination matrix
        return 2 * io_blocks + w_mat                # double-buffered I/O + W scratch

    if batch_block is None:
        batch_block = max(1, min(B, -(-256 // P)))  # ceil(256 / P) rows target
        while batch_block > 1 and _step_bytes(batch_block) > 24 * 1024 * 1024:
            batch_block -= 1
        while B % batch_block != 0:
            batch_block -= 1
    Bb = batch_block
    assert B % Bb == 0
    grid = (B // Bb,)

    weight_bytes = 2 * (2 * H * H + H * H) + 4 * (2 * H + H + 2 * H) + 4 * P * K
    vmem_limit = int(min(64 * 1024 * 1024,
                         max(32 * 1024 * 1024, 4 * _step_bytes(Bb) + 2 * weight_bytes)))

    def replicated(arr):
        nd = arr.ndim
        return pl.BlockSpec(arr.shape, lambda b, _nd=nd: (0,) * _nd)

    in_specs = [
        pl.BlockSpec((Bb, 1, H), lambda b: (b, 0, 0)),   # hoisted q
        pl.BlockSpec((Bb, P, H), lambda b: (b, 0, 0)),   # x_flat
        pl.BlockSpec((Bb, P, K), lambda b: (b, 0, 0)),   # attention_mask
        replicated(enc_idx),                             # (P, K) int32 — no one-hot
        replicated(wkv_b), replicated(bkv),
        replicated(wd_b), replicated(bd_f),
        replicated(gamma_f), replicated(beta_f),
    ]

    flops = B * (4 * P * H * H          # fused kv projection
                 + 2 * P * H            # scores matvec
                 + 4 * K * P * P        # gather/combine compares + fma (VPU)
                 + 2 * P * P * H        # W @ V
                 + 2 * P * H * H        # output dense
                 + 10 * P * H)          # residual + LayerNorm
    transcendentals = B * (P + P * K + 3 * P)
    bytes_accessed = (4 * B * (2 * P * H + P * K + H)
                      + 2 * (2 * H * H + H * H)
                      + 4 * (P * K + 2 * H + 4 * H))

    out = pl.pallas_call(
        gp_attention_kernel,
        out_shape=jax.ShapeDtypeStruct((B, P, H), jnp.float32),
        grid=grid,
        in_specs=in_specs,
        out_specs=pl.BlockSpec((Bb, P, H), lambda b: (b, 0, 0)),
        compiler_params=pltpu.CompilerParams(
            # Batch blocks are independent.  TODO(synk): pltpu.CORE_PARALLEL on
            # v7x once the batch-grid extent is >= 2 at production sizes.
            dimension_semantics=("parallel",),
            vmem_limit_bytes=vmem_limit,
        ),
        cost_estimate=pl.CostEstimate(
            flops=int(flops),
            transcendentals=int(transcendentals),
            bytes_accessed=int(bytes_accessed)),
    )(q, x_flat, mask, enc_idx, wkv_b, bkv, wd_b, bd_f, gamma_f, beta_f)

    return out.reshape(B, N, S, H)


def reference(user_emb, input_tensor, attention_mask, encoder_index, params):
    """Pure-JAX (f32) mirror of the PyTorch GPAttention.forward (eval mode)."""
    wq, bq, wk, bk, wv, bv, wd, bd, gamma, beta = params
    B, N, S, H = input_tensor.shape
    P, K = encoder_index.shape
    q = user_emb @ wq + bq                                   # (B, H)
    xf = input_tensor.reshape(B, P, H)
    k = xf @ wk + bk                                         # (B, P, H)
    v = xf @ wv + bv                                         # (B, P, H)
    scores = jnp.einsum('bh,bph->bp', q, k) / math.sqrt(H)   # (B, P)
    gs = scores[:, encoder_index]                            # (B, P, K)
    probs = jax.nn.softmax(gs + attention_mask, axis=-1)     # (B, P, K)
    gv = v[:, encoder_index.reshape(-1), :].reshape(B, P, K, H)
    ctx = jnp.einsum('bpk,bpkh->bph', probs, gv)             # (B, P, H)
    h = ctx @ wd + bd
    h = h + xf
    mu = h.mean(-1, keepdims=True)
    var = ((h - mu) ** 2).mean(-1, keepdims=True)
    out = gamma * ((h - mu) / jnp.sqrt(var + 1e-12)) + beta  # TF-style LN (eps inside sqrt)
    return out.reshape(B, N, S, H)


if __name__ == "__main__":
    # Small shapes: batch=2, sub-sessions N=2, sub-session length S=8, hidden=32,
    # num_attention_heads=4 (only validated in __init__, unused in compute),
    # K=4 gathered slots per position.
    B, N, S, H, K = 2, 2, 8, 32, 4
    num_attention_heads = 4
    assert H % num_attention_heads == 0
    P = N * S

    key = jax.random.PRNGKey(0)
    ks = jax.random.split(key, 16)

    user_emb = jax.random.normal(ks[0], (B, H), jnp.float32)
    input_tensor = jax.random.normal(ks[1], (B, N, S, H), jnp.float32)
    encoder_index = jax.random.randint(ks[2], (P, K), 0, P, dtype=jnp.int32)
    attention_mask = jnp.where(
        jax.random.bernoulli(ks[3], 0.8, (B, P, K)), 0.0, -10000.0
    ).astype(jnp.float32)

    # Deterministic parameter init (weights stored as (in, out) == torch weight^T).
    w_scale = 1.0 / math.sqrt(H)
    wq = jax.random.normal(ks[4], (H, H), jnp.float32) * w_scale
    wk = jax.random.normal(ks[5], (H, H), jnp.float32) * w_scale
    wv = jax.random.normal(ks[6], (H, H), jnp.float32) * w_scale
    wd = jax.random.normal(ks[7], (H, H), jnp.float32) * w_scale
    bq = jax.random.normal(ks[8], (1, H), jnp.float32) * 0.02
    bk = jax.random.normal(ks[9], (1, H), jnp.float32) * 0.02
    bv = jax.random.normal(ks[10], (1, H), jnp.float32) * 0.02
    bd = jax.random.normal(ks[11], (1, H), jnp.float32) * 0.02
    gamma = jnp.ones((1, H), jnp.float32)   # LayerNorm.weight
    beta = jnp.zeros((1, H), jnp.float32)   # LayerNorm.bias
    params = (wq, bq, wk, bk, wv, bv, wd, bd, gamma, beta)

    out = gp_attention(user_emb, input_tensor, attention_mask, encoder_index, params)
    out = jax.block_until_ready(out)

    ref = reference(user_emb, input_tensor, attention_mask, encoder_index, params)
    assert out.shape == (B, N, S, H), out.shape
    # bf16 MXU operands + EUP approx reciprocal -> looser tolerance vs the f32
    # reference (outputs are LayerNorm-normalized ~N(0,1), so this still catches
    # any gather / softmax / projection bug, which would produce O(1) errors).
    assert jnp.allclose(out, ref, atol=7.5e-2, rtol=7.5e-2), \
        float(jnp.max(jnp.abs(out - ref)))
    print("KERNEL_OK")
</pallas_src>

<mosaic_0001>
module attributes {stable_mosaic.version = 11 : i64} {
  func.func @gp_attention_kernel(%arg0: i32, %arg1: memref<2x1x32xf32, #tpu.memory_space<vmem>>, %arg2: memref<2x16x32xf32, #tpu.memory_space<vmem>>, %arg3: memref<2x16x4xf32, #tpu.memory_space<vmem>>, %arg4: memref<16x4xi32, #tpu.memory_space<vmem>>, %arg5: memref<32x64xbf16, #tpu.memory_space<vmem>>, %arg6: memref<1x64xf32, #tpu.memory_space<vmem>>, %arg7: memref<32x32xbf16, #tpu.memory_space<vmem>>, %arg8: memref<1x32xf32, #tpu.memory_space<vmem>>, %arg9: memref<1x32xf32, #tpu.memory_space<vmem>>, %arg10: memref<1x32xf32, #tpu.memory_space<vmem>>, %arg11: memref<2x16x32xf32, #tpu.memory_space<vmem>>) attributes {dimension_semantics = [#tpu.dimension_semantics<parallel>], iteration_bounds = array<i64: 1>, scalar_prefetch = 0 : i64, scratch_operands = 0 : i64, tpu.core_type = #tpu.core_type<tc>, window_params = [{transform_indices = @transform_0, window_bounds = array<i64: 2, 1, 32>}, {transform_indices = @transform_1, window_bounds = array<i64: 2, 16, 32>}, {transform_indices = @transform_2, window_bounds = array<i64: 2, 16, 4>}, {pipeline_mode = #tpu.pipeline_mode<synchronous>, transform_indices = @transform_3, window_bounds = array<i64: 16, 4>}, {pipeline_mode = #tpu.pipeline_mode<synchronous>, transform_indices = @transform_4, window_bounds = array<i64: 32, 64>}, {pipeline_mode = #tpu.pipeline_mode<synchronous>, transform_indices = @transform_5, window_bounds = array<i64: 1, 64>}, {pipeline_mode = #tpu.pipeline_mode<synchronous>, transform_indices = @transform_6, window_bounds = array<i64: 32, 32>}, {pipeline_mode = #tpu.pipeline_mode<synchronous>, transform_indices = @transform_7, window_bounds = array<i64: 1, 32>}, {pipeline_mode = #tpu.pipeline_mode<synchronous>, transform_indices = @transform_8, window_bounds = array<i64: 1, 32>}, {pipeline_mode = #tpu.pipeline_mode<synchronous>, transform_indices = @transform_9, window_bounds = array<i64: 1, 32>}, {transform_indices = @transform_10, window_bounds = array<i64: 2, 16, 32>}]} {
    %c0 = arith.constant 0 : index
    %c0_0 = arith.constant 0 : index
    %c0_1 = arith.constant 0 : index
    %0 = vector.load %arg2[%c0, %c0_0, %c0_1] : memref<2x16x32xf32, #tpu.memory_space<vmem>>, vector<2x16x32xf32>
    %1 = vector.shape_cast %0 : vector<2x16x32xf32> to vector<32x32xf32>
    %2 = arith.truncf %1 : vector<32x32xf32> to vector<32x32xbf16>
    %c0_2 = arith.constant 0 : index
    %c0_3 = arith.constant 0 : index
    %3 = vector.load %arg5[%c0_2, %c0_3] : memref<32x64xbf16, #tpu.memory_space<vmem>>, vector<32x64xbf16>
    %cst = arith.constant dense<0.000000e+00> : vector<32x64xf32>
    %4 = tpu.matmul %2, %3, %cst {dimension_numbers = #tpu.dot_dimension_numbers<[1], [0], [0], [1], [0, 0, 1, 1], [], []>} : vector<32x32xbf16>, vector<32x64xbf16>, vector<32x64xf32> -> vector<32x64xf32>
    %c0_4 = arith.constant 0 : index
    %c0_5 = arith.constant 0 : index
    %5 = vector.load %arg6[%c0_4, %c0_5] : memref<1x64xf32, #tpu.memory_space<vmem>>, vector<1x64xf32>
    %6 = vector.broadcast %5 : vector<1x64xf32> to vector<32x64xf32>
    %7 = arith.addf %4, %6 : vector<32x64xf32>
    %8 = vector.extract_strided_slice %7 {offsets = [0, 0], sizes = [32, 32], strides = [1, 1]} : vector<32x64xf32> to vector<32x32xf32>
    %9 = vector.shape_cast %8 : vector<32x32xf32> to vector<2x16x32xf32>
    %10 = arith.truncf %9 : vector<2x16x32xf32> to vector<2x16x32xbf16>
    %11 = vector.extract_strided_slice %7 {offsets = [0, 32], sizes = [32, 32], strides = [1, 1]} : vector<32x64xf32> to vector<32x32xf32>
    %12 = vector.shape_cast %11 : vector<32x32xf32> to vector<2x16x32xf32>
    %13 = arith.truncf %12 : vector<2x16x32xf32> to vector<2x16x32xbf16>
    %c0_6 = arith.constant 0 : index
    %c0_7 = arith.constant 0 : index
    %c0_8 = arith.constant 0 : index
    %14 = vector.load %arg1[%c0_6, %c0_7, %c0_8] : memref<2x1x32xf32, #tpu.memory_space<vmem>>, vector<2x1x32xf32>
    %15 = arith.truncf %14 : vector<2x1x32xf32> to vector<2x1x32xbf16>
    "tpu.trace_start"() <{level = 10 : i32, message = "bqh,bph->bqp"}> : () -> ()
    %cst_9 = arith.constant dense<0.000000e+00> : vector<2x1x16xf32>
    %16 = tpu.matmul %15, %10, %cst_9 {dimension_numbers = #tpu.dot_dimension_numbers<[2], [2], [1], [1], [0, 0, 0, 1, 1, 1], [0], [0]>} : vector<2x1x32xbf16>, vector<2x16x32xbf16>, vector<2x1x16xf32> -> vector<2x1x16xf32>
    "tpu.trace_stop"() : () -> ()
    %cst_10 = arith.constant 0.176776692 : f32
    %17 = vector.broadcast %cst_10 : f32 to vector<2x1x16xf32>
    %18 = arith.mulf %16, %17 : vector<2x1x16xf32>
    %cst_11 = arith.constant dense<0xFF800000> : vector<2x1xf32>
    %19 = vector.multi_reduction <maximumf>, %18, %cst_11 [2] : vector<2x1x16xf32> to vector<2x1xf32>
    %20 = vector.shape_cast %19 : vector<2x1xf32> to vector<2x1x1xf32>
    %21 = vector.broadcast %20 : vector<2x1x1xf32> to vector<2x1x16xf32>
    %22 = arith.subf %18, %21 : vector<2x1x16xf32>
    %23 = math.exp %22 : vector<2x1x16xf32>
    %c0_12 = arith.constant 0 : index
    %c0_13 = arith.constant 0 : index
    %c0_14 = arith.constant 0 : index
    %24 = vector.load %arg3[%c0_12, %c0_13, %c0_14] : memref<2x16x4xf32, #tpu.memory_space<vmem>>, vector<2x16x4xf32>
    %cst_15 = arith.constant -3.000000e+01 : f32
    %25 = vector.broadcast %cst_15 : f32 to vector<2x16x4xf32>
    %26 = arith.maximumf %24, %25 : vector<2x16x4xf32>
    %27 = math.exp %26 : vector<2x16x4xf32>
    %28 = tpu.iota {dimensions = array<i32: 1>} : vector<16x16xi32>
    %c0_16 = arith.constant 0 : index
    %c0_17 = arith.constant 0 : index
    %29 = vector.load %arg4[%c0_16, %c0_17] : memref<16x4xi32, #tpu.memory_space<vmem>>, vector<16x4xi32>
    %cst_18 = arith.constant 0.000000e+00 : f32
    %30 = vector.broadcast %cst_18 : f32 to vector<2x16x16xf32>
    %31 = vector.extract_strided_slice %29 {offsets = [0, 0], sizes = [16, 1], strides = [1, 1]} : vector<16x4xi32> to vector<16x1xi32>
    %32 = vector.broadcast %31 : vector<16x1xi32> to vector<16x16xi32>
    %33 = arith.cmpi eq, %28, %32 : vector<16x16xi32>
    %34 = vector.shape_cast %33 : vector<16x16xi1> to vector<1x16x16xi1>
    %cst_19 = arith.constant 0.000000e+00 : f32
    %35 = vector.shape_cast %34 : vector<1x16x16xi1> to vector<1x16x16xi1>
    %36 = vector.broadcast %35 : vector<1x16x16xi1> to vector<2x16x16xi1>
    %37 = vector.shape_cast %23 : vector<2x1x16xf32> to vector<2x1x16xf32>
    %38 = vector.broadcast %37 : vector<2x1x16xf32> to vector<2x16x16xf32>
    %39 = vector.broadcast %cst_19 : f32 to vector<2x16x16xf32>
    %40 = arith.select %36, %38, %39 : vector<2x16x16xi1>, vector<2x16x16xf32>
    %41 = vector.extract_strided_slice %27 {offsets = [0, 0, 0], sizes = [2, 16, 1], strides = [1, 1, 1]} : vector<2x16x4xf32> to vector<2x16x1xf32>
    %42 = vector.broadcast %41 : vector<2x16x1xf32> to vector<2x16x16xf32>
    %43 = arith.mulf %40, %42 : vector<2x16x16xf32>
    %44 = arith.addf %30, %43 : vector<2x16x16xf32>
    %45 = vector.extract_strided_slice %29 {offsets = [0, 1], sizes = [16, 1], strides = [1, 1]} : vector<16x4xi32> to vector<16x1xi32>
    %46 = vector.broadcast %45 : vector<16x1xi32> to vector<16x16xi32>
    %47 = arith.cmpi eq, %28, %46 : vector<16x16xi32>
    %48 = vector.shape_cast %47 : vector<16x16xi1> to vector<1x16x16xi1>
    %cst_20 = arith.constant 0.000000e+00 : f32
    %49 = vector.shape_cast %48 : vector<1x16x16xi1> to vector<1x16x16xi1>
    %50 = vector.broadcast %49 : vector<1x16x16xi1> to vector<2x16x16xi1>
    %51 = vector.shape_cast %23 : vector<2x1x16xf32> to vector<2x1x16xf32>
    %52 = vector.broadcast %51 : vector<2x1x16xf32> to vector<2x16x16xf32>
    %53 = vector.broadcast %cst_20 : f32 to vector<2x16x16xf32>
    %54 = arith.select %50, %52, %53 : vector<2x16x16xi1>, vector<2x16x16xf32>
    %55 = vector.extract_strided_slice %27 {offsets = [0, 0, 1], sizes = [2, 16, 1], strides = [1, 1, 1]} : vector<2x16x4xf32> to vector<2x16x1xf32>
    %56 = vector.broadcast %55 : vector<2x16x1xf32> to vector<2x16x16xf32>
    %57 = arith.mulf %54, %56 : vector<2x16x16xf32>
    %58 = arith.addf %44, %57 : vector<2x16x16xf32>
    %59 = vector.extract_strided_slice %29 {offsets = [0, 2], sizes = [16, 1], strides = [1, 1]} : vector<16x4xi32> to vector<16x1xi32>
    %60 = vector.broadcast %59 : vector<16x1xi32> to vector<16x16xi32>
    %61 = arith.cmpi eq, %28, %60 : vector<16x16xi32>
    %62 = vector.shape_cast %61 : vector<16x16xi1> to vector<1x16x16xi1>
    %cst_21 = arith.constant 0.000000e+00 : f32
    %63 = vector.shape_cast %62 : vector<1x16x16xi1> to vector<1x16x16xi1>
    %64 = vector.broadcast %63 : vector<1x16x16xi1> to vector<2x16x16xi1>
    %65 = vector.shape_cast %23 : vector<2x1x16xf32> to vector<2x1x16xf32>
    %66 = vector.broadcast %65 : vector<2x1x16xf32> to vector<2x16x16xf32>
    %67 = vector.broadcast %cst_21 : f32 to vector<2x16x16xf32>
    %68 = arith.select %64, %66, %67 : vector<2x16x16xi1>, vector<2x16x16xf32>
    %69 = vector.extract_strided_slice %27 {offsets = [0, 0, 2], sizes = [2, 16, 1], strides = [1, 1, 1]} : vector<2x16x4xf32> to vector<2x16x1xf32>
    %70 = vector.broadcast %69 : vector<2x16x1xf32> to vector<2x16x16xf32>
    %71 = arith.mulf %68, %70 : vector<2x16x16xf32>
    %72 = arith.addf %58, %71 : vector<2x16x16xf32>
    %73 = vector.extract_strided_slice %29 {offsets = [0, 3], sizes = [16, 1], strides = [1, 1]} : vector<16x4xi32> to vector<16x1xi32>
    %74 = vector.broadcast %73 : vector<16x1xi32> to vector<16x16xi32>
    %75 = arith.cmpi eq, %28, %74 : vector<16x16xi32>
    %76 = vector.shape_cast %75 : vector<16x16xi1> to vector<1x16x16xi1>
    %cst_22 = arith.constant 0.000000e+00 : f32
    %77 = vector.shape_cast %76 : vector<1x16x16xi1> to vector<1x16x16xi1>
    %78 = vector.broadcast %77 : vector<1x16x16xi1> to vector<2x16x16xi1>
    %79 = vector.shape_cast %23 : vector<2x1x16xf32> to vector<2x1x16xf32>
    %80 = vector.broadcast %79 : vector<2x1x16xf32> to vector<2x16x16xf32>
    %81 = vector.broadcast %cst_22 : f32 to vector<2x16x16xf32>
    %82 = arith.select %78, %80, %81 : vector<2x16x16xi1>, vector<2x16x16xf32>
    %83 = vector.extract_strided_slice %27 {offsets = [0, 0, 3], sizes = [2, 16, 1], strides = [1, 1, 1]} : vector<2x16x4xf32> to vector<2x16x1xf32>
    %84 = vector.broadcast %83 : vector<2x16x1xf32> to vector<2x16x16xf32>
    %85 = arith.mulf %82, %84 : vector<2x16x16xf32>
    %86 = arith.addf %72, %85 : vector<2x16x16xf32>
    %cst_23 = arith.constant dense<0.000000e+00> : vector<2x16xf32>
    %87 = vector.multi_reduction <add>, %86, %cst_23 [2] : vector<2x16x16xf32> to vector<2x16xf32>
    %88 = vector.shape_cast %87 : vector<2x16xf32> to vector<2x16x1xf32>
    %cst_24 = arith.constant 1.000000e-30 : f32
    %89 = vector.broadcast %cst_24 : f32 to vector<2x16x1xf32>
    %90 = arith.maximumf %88, %89 : vector<2x16x1xf32>
    %91 = tpu.reciprocal %90 {approx = true} : vector<2x16x1xf32> -> vector<2x16x1xf32>
    %92 = vector.broadcast %91 : vector<2x16x1xf32> to vector<2x16x16xf32>
    %93 = arith.mulf %86, %92 : vector<2x16x16xf32>
    %94 = arith.truncf %93 : vector<2x16x16xf32> to vector<2x16x16xbf16>
    "tpu.trace_start"() <{level = 10 : i32, message = "bpq,bqh->bph"}> : () -> ()
    %cst_25 = arith.constant dense<0.000000e+00> : vector<2x16x32xf32>
    %95 = tpu.matmul %94, %13, %cst_25 {dimension_numbers = #tpu.dot_dimension_numbers<[2], [1], [1], [2], [0, 0, 0, 1, 1, 2], [0], [0]>} : vector<2x16x16xbf16>, vector<2x16x32xbf16>, vector<2x16x32xf32> -> vector<2x16x32xf32>
    "tpu.trace_stop"() : () -> ()
    %96 = vector.shape_cast %95 : vector<2x16x32xf32> to vector<32x32xf32>
    %97 = arith.truncf %96 : vector<32x32xf32> to vector<32x32xbf16>
    %c0_26 = arith.constant 0 : index
    %c0_27 = arith.constant 0 : index
    %98 = vector.load %arg7[%c0_26, %c0_27] : memref<32x32xbf16, #tpu.memory_space<vmem>>, vector<32x32xbf16>
    %cst_28 = arith.constant dense<0.000000e+00> : vector<32x32xf32>
    %99 = tpu.matmul %97, %98, %cst_28 {dimension_numbers = #tpu.dot_dimension_numbers<[1], [0], [0], [1], [0, 0, 1, 1], [], []>} : vector<32x32xbf16>, vector<32x32xbf16>, vector<32x32xf32> -> vector<32x32xf32>
    %c0_29 = arith.constant 0 : index
    %c0_30 = arith.constant 0 : index
    %100 = vector.load %arg8[%c0_29, %c0_30] : memref<1x32xf32, #tpu.memory_space<vmem>>, vector<1x32xf32>
    %101 = vector.broadcast %100 : vector<1x32xf32> to vector<32x32xf32>
    %102 = arith.addf %99, %101 : vector<32x32xf32>
    %103 = arith.addf %102, %1 : vector<32x32xf32>
    %cst_31 = arith.constant dense<0.000000e+00> : vector<32xf32>
    %104 = vector.multi_reduction <add>, %103, %cst_31 [1] : vector<32x32xf32> to vector<32xf32>
    %105 = vector.shape_cast %104 : vector<32xf32> to vector<32x1xf32>
    %cst_32 = arith.constant 3.200000e+01 : f32
    %106 = vector.broadcast %cst_32 : f32 to vector<32x1xf32>
    %107 = arith.divf %105, %106 : vector<32x1xf32>
    %108 = vector.broadcast %107 : vector<32x1xf32> to vector<32x32xf32>
    %109 = arith.subf %103, %108 : vector<32x32xf32>
    %110 = arith.mulf %109, %109 : vector<32x32xf32>
    %cst_33 = arith.constant dense<0.000000e+00> : vector<32xf32>
    %111 = vector.multi_reduction <add>, %110, %cst_33 [1] : vector<32x32xf32> to vector<32xf32>
    %112 = vector.shape_cast %111 : vector<32xf32> to vector<32x1xf32>
    %cst_34 = arith.constant 3.200000e+01 : f32
    %113 = vector.broadcast %cst_34 : f32 to vector<32x1xf32>
    %114 = arith.divf %112, %113 : vector<32x1xf32>
    %cst_35 = arith.constant 9.99999996E-13 : f32
    %115 = vector.broadcast %cst_35 : f32 to vector<32x1xf32>
    %116 = arith.addf %114, %115 : vector<32x1xf32>
    %117 = math.rsqrt %116 : vector<32x1xf32>
    %118 = vector.broadcast %117 : vector<32x1xf32> to vector<32x32xf32>
    %119 = arith.mulf %109, %118 : vector<32x32xf32>
    %c0_36 = arith.constant 0 : index
    %c0_37 = arith.constant 0 : index
    %120 = vector.load %arg9[%c0_36, %c0_37] : memref<1x32xf32, #tpu.memory_space<vmem>>, vector<1x32xf32>
    %121 = vector.broadcast %120 : vector<1x32xf32> to vector<32x32xf32>
    %122 = arith.mulf %121, %119 : vector<32x32xf32>
    %c0_38 = arith.constant 0 : index
    %c0_39 = arith.constant 0 : index
    %123 = vector.load %arg10[%c0_38, %c0_39] : memref<1x32xf32, #tpu.memory_space<vmem>>, vector<1x32xf32>
    %124 = vector.broadcast %123 : vector<1x32xf32> to vector<32x32xf32>
    %125 = arith.addf %122, %124 : vector<32x32xf32>
    %126 = vector.shape_cast %125 : vector<32x32xf32> to vector<2x16x32xf32>
    %c0_40 = arith.constant 0 : index
    %c0_41 = arith.constant 0 : index
    %c0_42 = arith.constant 0 : index
    %127 = vector.load %arg11[%c0_40, %c0_41, %c0_42] : memref<2x16x32xf32, #tpu.memory_space<vmem>>, vector<2x16x32xf32>
    tpu.vector_store %arg11[%c0_40, %c0_41, %c0_42], %126 {strides = array<i32>} : memref<2x16x32xf32, #tpu.memory_space<vmem>>, vector<2x16x32xf32>,
    return
  }
  func.func @transform_0(%arg0: i32) -> (i32, i32, i32) {
    %c0_i32 = arith.constant 0 : i32
    %c0_i32_0 = arith.constant 0 : i32
    %c0_i32_1 = arith.constant 0 : i32
    return %arg0, %c0_i32, %c0_i32_0 : i32, i32, i32
  }
  func.func @transform_1(%arg0: i32) -> (i32, i32, i32) {
    %c0_i32 = arith.constant 0 : i32
    %c0_i32_0 = arith.constant 0 : i32
    %c0_i32_1 = arith.constant 0 : i32
    return %arg0, %c0_i32, %c0_i32_0 : i32, i32, i32
  }
  func.func @transform_2(%arg0: i32) -> (i32, i32, i32) {
    %c0_i32 = arith.constant 0 : i32
    %c0_i32_0 = arith.constant 0 : i32
    %c0_i32_1 = arith.constant 0 : i32
    return %arg0, %c0_i32, %c0_i32_0 : i32, i32, i32
  }
  func.func @transform_3(%arg0: i32) -> (i32, i32) {
    %c0_i32 = arith.constant 0 : i32
    %c0_i32_0 = arith.constant 0 : i32
    %c0_i32_1 = arith.constant 0 : i32
    return %c0_i32, %c0_i32_0 : i32, i32
  }
  func.func @transform_4(%arg0: i32) -> (i32, i32) {
    %c0_i32 = arith.constant 0 : i32
    %c0_i32_0 = arith.constant 0 : i32
    %c0_i32_1 = arith.constant 0 : i32
    return %c0_i32, %c0_i32_0 : i32, i32
  }
  func.func @transform_5(%arg0: i32) -> (i32, i32) {
    %c0_i32 = arith.constant 0 : i32
    %c0_i32_0 = arith.constant 0 : i32
    %c0_i32_1 = arith.constant 0 : i32
    return %c0_i32, %c0_i32_0 : i32, i32
  }
  func.func @transform_6(%arg0: i32) -> (i32, i32) {
    %c0_i32 = arith.constant 0 : i32
    %c0_i32_0 = arith.constant 0 : i32
    %c0_i32_1 = arith.constant 0 : i32
    return %c0_i32, %c0_i32_0 : i32, i32
  }
  func.func @transform_7(%arg0: i32) -> (i32, i32) {
    %c0_i32 = arith.constant 0 : i32
    %c0_i32_0 = arith.constant 0 : i32
    %c0_i32_1 = arith.constant 0 : i32
    return %c0_i32, %c0_i32_0 : i32, i32
  }
  func.func @transform_8(%arg0: i32) -> (i32, i32) {
    %c0_i32 = arith.constant 0 : i32
    %c0_i32_0 = arith.constant 0 : i32
    %c0_i32_1 = arith.constant 0 : i32
    return %c0_i32, %c0_i32_0 : i32, i32
  }
  func.func @transform_9(%arg0: i32) -> (i32, i32) {
    %c0_i32 = arith.constant 0 : i32
    %c0_i32_0 = arith.constant 0 : i32
    %c0_i32_1 = arith.constant 0 : i32
    return %c0_i32, %c0_i32_0 : i32, i32
  }
  func.func @transform_10(%arg0: i32) -> (i32, i32, i32) {
    %c0_i32 = arith.constant 0 : i32
    %c0_i32_0 = arith.constant 0 : i32
    %c0_i32_1 = arith.constant 0 : i32
    return %arg0, %c0_i32, %c0_i32_0 : i32, i32, i32
  }
}

</mosaic_0001>

<bundles_post_ra>
// kernel: tpu_custom_call.1
= control target key start
LH: loop header
LB: loop body
LE: loop exit
PB: predicated region body
PF: predicated region fallthrough
CT: control target
= control target key end

     0   :  { %vm66_vm0 = vcmask 261120   ;;  %s1152_s0 = inlined_call_operand.vmem [shape: f32[2,1,32], index: 0, kind: input, shape index: {}]   ;;  %s1153_s1 = inlined_call_operand.vmem [shape: f32[2,16,32], index: 1, kind: input, shape index: {}]   ;;  %s1154_s2 = inlined_call_operand.vmem [shape: f32[2,16,4], index: 2, kind: input, shape index: {}]   ;;  %s1155_s3 = inlined_call_operand.vmem [shape: s32[16,4], index: 3, kind: input, shape index: {}]   ;;  %s1156_s4 = inlined_call_operand.vmem [shape: bf16[32,64], index: 4, kind: input, shape index: {}]   ;;  %s1157_s5 = inlined_call_operand.vmem [shape: f32[1,64], index: 5, kind: input, shape index: {}]   ;;  %s1158_s6 = inlined_call_operand.vmem [shape: bf16[32,32], index: 6, kind: input, shape index: {}]   ;;  %s1159_s7 = inlined_call_operand.vmem [shape: f32[1,32], index: 7, kind: input, shape index: {}]   ;;  %s1160_s8 = inlined_call_operand.vmem [shape: f32[1,32], index: 8, kind: input, shape index: {}]   ;;  %s1161_s9 = inlined_call_operand.vmem [shape: f32[1,32], index: 9, kind: input, shape index: {}]   ;;  %s1162_s10 = inlined_call_operand.hbm [shape: f32[2,16,32], index: 10, kind: output, shape index: {}]  }
   0x1   :  { %v825_v0 = vld [vmem:[%s1156_s4] sm:$0xff]   ;;  %v826_v1 = vld [vmem:[%s1156_s4 + $0x8] sm:$0xff]   ;;  %v965_v4 = vld [vmem:[%s1153_s1 + $0x10] sm:$0xff] }
   0x2   :  { %761 = vmatprep.subr.bf16.mxu0 %v825_v0  ;;  %v955_v2 = vld [vmem:[%s1153_s1] sm:$0xff]  ;;  %v960_v3 = vld [vmem:[%s1153_s1 + $0x8] sm:$0xff]  ;;  %v972_v6 = vld [vmem:[%s1153_s1 + $0x18] sm:$0xff] }
   0x3   :  { %762 = vmatpush3.bf16.msra.mxu0 %v825_v0  ;;  %v41_v5 = vpack.c.bf16 %v960_v3, %v955_v2 }
   0x4   :  { %763 = vmatprep.subr.bf16.mxu0 %v826_v1 }
   0x5   :  { %15 = vsyncpa [#allocation3], 0  ;;  %765 = vmatprep.mubr.msk.bf16.mxu0 %vm66_vm0, %v41_v5  ;;  %v42_v7 = vpack.c.bf16 %v972_v6, %v965_v4  ;;  %v881_v8 = vmov 0.0   ;;  %vm882_vm1 = vmmov 0   ;;  %v253_v9 = vld [vmem:[%s1155_s3] sm:$0xff]  ;;  %v883_v11 = vmov 0  }
   0x6   :  { %769 = vmatprep.subr.bf16.mxu1 %v881_v8  ;;  %771 = vmatprep.mubr.msk.bf16.mxu1 %vm882_vm1, %v881_v8  ;;  %v235_v10 = vld [vmem:[%s1154_s2] sm:$0xff]  ;;  %v884_v12 = vmov 1   ;;  %v236_v14 = vld [vmem:[%s1154_s2 + $0x8] sm:$0xff]  ;;  %v885_v19 = vmov 2   ;;  %v237_v22 = vld [vmem:[%s1154_s2 + $0x10] sm:$0xff]  ;;  %v886_v23 = vmov 3  }
   0x7   :  { %764 = vmatpush3.bf16.msra.mxu0 %v826_v1  ;;  %811 = vset.pattern.permute.xlu1 %v883_v11  ;;  %v239_v13 = vmax.f32 %v235_v10, -30.0  ;;  %v240_v15 = vmax.f32 %v236_v14, -30.0  ;;  %v254_v16 = vld [vmem:[%s1155_s3 + $0x8] sm:$0xff]  ;;  %v241_v24 = vmax.f32 %v237_v22, -30.0  ;;  %v238_v25 = vld [vmem:[%s1154_s2 + $0x18] sm:$0xff]  ;;  %vm222_vm2 = vcmask 122880  }
   0x8   :  { %775 = vmatprep.subr.bf16.mxu0 %v881_v8  ;;  %812 = vset.pattern.permute.xlu0 %v884_v12  ;;  %v242_v27 = vmax.f32 %v238_v25, -30.0  ;;  %v729_v32 = vld [vmem:[%s1157_s5] ss:$0 sm:$0xff]  ;;  %v125_v44 = vld [vmem:[%s1152_s0 + $0x1] sm:$0x1]  ;;  %v251_v25 = vlaneseq  ;;  %vm427_vm11 = vcmask 130048  }
   0x9   :  { %256 = vperm.xlu1 %811, %v253_v9   ;;  %308 = vperm.xlu0 %812, %v253_v9   ;;  %v243_v17 = vmul.f32 1.442695, %v239_v13  ;;  %v245_v18 = vmul.f32 1.442695, %v240_v15  ;;  %v247_v26 = vmul.f32 1.442695, %v241_v24  ;;  %v127_v46 = vpack.c.bf16 %v125_v44, %v125_v44 }
   0xa   :  { %766 = vmatmul.mubr.msk.bf16.vlgmr.msra.gmra.mrb[0].mxu0 %vm66_vm0, %v42_v7  ;;  %v249_v28 = vmul.f32 1.442695, %v242_v27  ;;  %v124_v45 = vld [vmem:[%s1152_s0] sm:$0x1]  ;;  %v268_v27 = vshrl.u32 %v251_v25, 7  ;;  %s887_s0 = smov 96  }
   0xb   :  { %777 = vmatprep.mubr.msk.bf16.mxu0 %vm882_vm1, %v881_v8  ;;  %829 = vpow2.f32 %v243_v17  ;;  %v126_v47 = vpack.c.bf16 %v124_v45, %v124_v45  ;;  %s888_s24 = smov [#allocation2]  }
   0xc   :  { %831 = vpow2.f32 %v245_v18 }
   0xd   :  { %259 = vperm.xlu1 %811, %v254_v16   ;;  %819 = vset.pattern.permute.xlu0 %v885_v19  ;;  %833 = vpow2.f32 %v247_v26 }
   0xe   :  { %835 = vpow2.f32 %v249_v28 }
  0x11   :  { %813 = vset.pattern.permute.xlu1 %v884_v12 }
  0x12   :  { %311 = vperm.xlu1 %813, %v254_v16  }
  0x15   :  { %v830_v20 = vpop.eup %829 }
  0x16   :  { %814 = vset.pattern.permute.xlu1 %v883_v11  ;;  %364 = vperm.xlu0 %819, %v830_v20   ;;  %v832_v21 = vpop.eup %831 }
  0x17   :  { %281 = vperm.xlu1 %814, %v830_v20   ;;  %v834_v29 = vpop.eup %833 }
  0x18   :  { %v836_v30 = vpop.eup %835 }
  0x1a   :  { %822 = vset.pattern.permute.xlu0 %v886_v23 }
  0x1b   :  { %286 = vperm.xlu1 %814, %v832_v21   ;;  %391 = vperm.xlu0 %822, %v254_v16  }
  0x1f   :  { %815 = vset.pattern.permute.xlu1 %v884_v12  ;;  %404 = vperm.xlu0 %822, %v830_v20  }
  0x20   :  { %324 = vperm.xlu1 %815, %v830_v20  }
  0x24   :  { %328 = vperm.xlu1 %815, %v832_v21  }
  0x28   :  { %816 = vset.pattern.permute.xlu1 %v885_v19 }
  0x29   :  { %348 = vperm.xlu1 %816, %v253_v9  }
  0x2d   :  { %351 = vperm.xlu1 %816, %v254_v16  }
  0x31   :  { %817 = vset.pattern.permute.xlu1 %v883_v11 }
  0x32   :  { %291 = vperm.xlu1 %817, %v834_v29  }
  0x36   :  { %296 = vperm.xlu1 %817, %v836_v30  }
  0x3a   :  { %818 = vset.pattern.permute.xlu1 %v884_v12 }
  0x3b   :  { %332 = vperm.xlu1 %818, %v834_v29  }
  0x3f   :  { %336 = vperm.xlu1 %818, %v836_v30  }
  0x43   :  { %820 = vset.pattern.permute.xlu1 %v885_v19 }
  0x44   :  { %368 = vperm.xlu1 %820, %v832_v21  }
  0x48   :  { %821 = vset.pattern.permute.xlu1 %v886_v23 }
  0x49   :  { %388 = vperm.xlu1 %821, %v253_v9  }
  0x4d   :  { %823 = vset.pattern.permute.xlu1 %v885_v19 }
  0x4e   :  { %372 = vperm.xlu1 %823, %v834_v29  }
  0x52   :  { %376 = vperm.xlu1 %823, %v836_v30  }
  0x56   :  { %824 = vset.pattern.permute.xlu1 %v886_v23 }
  0x57   :  { %408 = vperm.xlu1 %824, %v832_v21  }
  0x5b   :  { %416 = vperm.xlu1 %824, %v836_v30   ;;  %v269_v30 = vsub.s32 0, %v268_v27 }
  0x88   :  { %v1027_v60 = vpop.permute.xlu1 %256  ;;  %v1045_v11 = vpop.permute.xlu0 %308 }
  0x8c   :  { %v1029_v61 = vpop.permute.xlu1 %259 }
  0x91   :  { %v1031_v62 = vpop.permute.xlu1 %311 }
  0x95   :  { %v1047_v13 = vpop.permute.xlu0 %364 }
  0x96   :  { %v1033_v63 = vpop.permute.xlu1 %281 }
  0x9a   :  { %v1035_v0 = vpop.permute.xlu1 %286  ;;  %v392_v15 = vpop.permute.xlu0 %391 }
  0x9e   :  { %v1051_v17 = vpop.permute.xlu0 %404 }
  0x9f   :  { %v1037_v1 = vpop.permute.xlu1 %324 }
  0xa3   :  { %v1039_v5 = vpop.permute.xlu1 %328 }
  0xa8   :  { %v1041_v7 = vpop.permute.xlu1 %348 }
  0xdd   :  { %v767_v31 = vpop.f32.mrb[0].mxu0 }
  0xde   :  { %v107_v33 = vpop.f32.mrb[1].mxu0  ;;  %v116_v35 = vadd.f32 %v767_v31, %v729_v32 }
  0xdf   :  { %v768_v34 = vpop.f32.mrb[2].mxu0  ;;  %v108_v38 = vadd.f32 %v729_v32, %v107_v33 }
  0xe0   :  { %v119_v36 = vadd.f32 %v768_v34, %v729_v32  ;;  %v110_v37 = vpop.f32.mrb[3].mxu0 }
  0xe1   :  { %v111_v39 = vadd.f32 %v729_v32, %v110_v37 }
  0xe2   :  { %v1005_v40 = vpack.c.bf16 %v119_v36, %v116_v35 }
  0xe3   :  { %v1007_v41 = vpack.c.bf16 %v111_v39, %v108_v38 }
  0xe4   :  { %v178_v42 = vsel %vm66_vm0, %v1005_v40, 0 }
  0xe5   :  { %776 = vmatpush3.bf16.xpose.msra.mxu0 %v178_v42  ;;  %v132_v43 = vsel %vm66_vm0, %v1007_v41, 0 }
  0xe6   :  { %770 = vmatpush3.bf16.xpose.msra.mxu1 %v132_v43  ;;  %787 = vmatprep.subr.bf16.mxu0 %v881_v8 }
  0xe7   :  { %781 = vmatprep.subr.bf16.mxu1 %v881_v8 }
  0xec   :  { %778 = vmatmul.mubr.msk.bf16.vlgmr.msra.gmra.mrb[4].mxu0 %vm66_vm0, %v127_v46 }
  0xed   :  { %772 = vmatmul.mubr.msk.bf16.vlgmr.msra.gmra.mrb[0].mxu1 %vm66_vm0, %v126_v47  ;;  %789 = vmatprep.mubr.msk.bf16.mxu0 %vm882_vm1, %v881_v8 }
  0xee   :  { %783 = vmatprep.mubr.msk.bf16.mxu1 %vm882_vm1, %v881_v8  ;;  %v1043_v8 = vpop.permute.xlu1 %351 }
  0xf2   :  { %v292_v9 = vpop.permute.xlu1 %291 }
  0xf6   :  { %v297_v10 = vpop.permute.xlu1 %296 }
  0xfa   :  { %v333_v12 = vpop.permute.xlu1 %332 }
  0xfe   :  { %v337_v14 = vpop.permute.xlu1 %336 }
 0x102   :  { %v1049_v16 = vpop.permute.xlu1 %368 }
 0x106   :  { %v1053_v18 = vpop.permute.xlu1 %388 }
 0x10a   :  { %v373_v23 = vpop.permute.xlu1 %372 }
 0x10e   :  { %v377_v28 = vpop.permute.xlu1 %376 }
 0x112   :  { %v409_v33 = vpop.permute.xlu1 %408 }
 0x1bf   :  { %v214_v48 = vpop.f32.mrb[4].mxu0 }
 0x1c0   :  { %v221_v49 = vmul.f32 0.17677669, %v214_v48  ;;  %v779_v50 = vpop.f32.mrb[5].mxu0  ;;  %v168_v51 = vpop.f32.mrb[0].mxu1 }
 0x1c1   :  { %v217_v52 = vpop.f32.mrb[6].mxu0  ;;  %v220_v53 = vmul.f32 0.17677669, %v168_v51  ;;  %v773_v54 = vpop.f32.mrb[1].mxu1 }
 0x1c2   :  { %v780_v55 = vpop.f32.mrb[7].mxu0  ;;  %v226_v56 = vsel %vm222_vm2, %v221_v49, -inf  ;;  %v171_v57 = vpop.f32.mrb[2].mxu1 }
 0x1c3   :  { %227 = vmax.xlane.f32.xlu0 %v226_v56  ;;  %v774_v58 = vpop.f32.mrb[3].mxu1  ;;  %v223_v59 = vsel %vm222_vm2, %v220_v53, -inf }
 0x1c7   :  { %224 = vmax.xlane.f32.xlu0 %v223_v59 }
 0x1dd   :  { %412 = vperm.xlu0 %822, %v834_v29   ;;  %v252_v29 = vand.u32 127, %v251_v25 }
 0x1df   :  { %vm313_vm3 = vcmp.eq.s32.totalorder %v252_v29, %v1045_v11  ;;  %vm261_vm4 = vcmp.eq.s32.totalorder %v252_v29, %v1027_v60  ;;  %vm262_vm5 = vcmp.eq.s32.totalorder %v252_v29, %v1029_v61  ;;  %vm394_vm6 = vcmp.eq.s32.totalorder %v252_v29, %v392_v15 }
 0x1e0   :  { %vm314_vm7 = vcmp.eq.s32.totalorder %v252_v29, %v1031_v62  ;;  %vm353_vm8 = vcmp.eq.s32.totalorder %v252_v29, %v1041_v7  ;;  %vm354_vm9 = vcmp.eq.s32.totalorder %v252_v29, %v1043_v8  ;;  %vm393_vm10 = vcmp.eq.s32.totalorder %v252_v29, %v1053_v18 }
 0x250   :  { %v228_v19 = vpop.xlane.xlu0 %227 }
 0x251   :  { %v230_v20 = vsub.f32 %v221_v49, %v228_v19 }
 0x253   :  { %v233_v21 = vmul.f32 1.442695, %v230_v20 }
 0x254   :  { %v225_v22 = vpop.xlane.xlu0 %224 }
 0x255   :  { %837 = vpow2.f32 %v233_v21  ;;  %v229_v24 = vsub.f32 %v220_v53, %v225_v22  ;;  %v417_v53 = vpop.permute.xlu1 %416 }
 0x257   :  { %v231_v26 = vmul.f32 1.442695, %v229_v24 }
 0x259   :  { %839 = vpow2.f32 %v231_v26 }
 0x25c   :  { %v413_v52 = vpop.permute.xlu0 %412 }
 0x25f   :  { %v838_v31 = vpop.eup %837 }
 0x260   :  { %v274_v32 = vrot.slane %v838_v31, %v269_v30 }
 0x262   :  { %v277_v34 = vsel %vm261_vm4, %v274_v32, 0.0  ;;  %v321_v35 = vsel %vm313_vm3, %v274_v32, 0.0  ;;  %v361_v36 = vsel %vm353_vm8, %v274_v32, 0.0  ;;  %v278_v37 = vsel %vm262_vm5, %v274_v32, 0.0 }
 0x263   :  { %v840_v38 = vpop.eup %839  ;;  %v301_v39 = vmul.f32 %v292_v9, %v277_v34  ;;  %v341_v42 = vmul.f32 %v333_v12, %v321_v35  ;;  %v302_v43 = vmul.f32 %v297_v10, %v278_v37  ;;  %v322_v45 = vsel %vm314_vm7, %v274_v32, 0.0 }
 0x264   :  { %v270_v44 = vrot.slane %v840_v38, %v269_v30  ;;  %v362_v46 = vsel %vm354_vm9, %v274_v32, 0.0  ;;  %v401_v47 = vsel %vm393_vm10, %v274_v32, 0.0  ;;  %v381_v49 = vmul.f32 %v373_v23, %v361_v36 }
 0x265   :  { %v345_v48 = vadd.f32 %v341_v42, %v301_v39  ;;  %v342_v50 = vmul.f32 %v337_v14, %v322_v45  ;;  %v382_v51 = vmul.f32 %v377_v28, %v362_v46  ;;  %v402_v54 = vsel %vm394_vm6, %v274_v32, 0.0 }
 0x266   :  { %v276_v55 = vsel %vm262_vm5, %v270_v44, 0.0  ;;  %v320_v56 = vsel %vm314_vm7, %v270_v44, 0.0  ;;  %v421_v59 = vmul.f32 %v413_v52, %v401_v47  ;;  %v400_v9 = vsel %vm394_vm6, %v270_v44, 0.0 }
 0x267   :  { %v385_v57 = vadd.f32 %v381_v49, %v345_v48  ;;  %v346_v58 = vadd.f32 %v342_v50, %v302_v43  ;;  %v300_v10 = vmul.f32 %v1035_v0, %v276_v55  ;;  %v340_v12 = vmul.f32 %v1039_v5, %v320_v56  ;;  %v827_v48 = vld [vmem:[%s1158_s6] sm:$0xff]   ;;  %v828_v49 = vld [vmem:[%s1158_s6 + $0x8] sm:$0xff]  }
 0x268   :  { %v360_v14 = vsel %vm354_vm9, %v270_v44, 0.0  ;;  %v275_v19 = vsel %vm261_vm4, %v270_v44, 0.0  ;;  %v422_v20 = vmul.f32 %v417_v53, %v402_v54  ;;  %v319_v15 = vsel %vm313_vm3, %v270_v44, 0.0 }
 0x269   :  { %v386_v61 = vadd.f32 %v382_v51, %v346_v58  ;;  %v425_v21 = vadd.f32 %v421_v59, %v385_v57  ;;  %v299_v62 = vmul.f32 %v1033_v63, %v275_v19  ;;  %v344_v22 = vadd.f32 %v340_v12, %v300_v10 }
 0x26a   :  { %v380_v23 = vmul.f32 %v1049_v16, %v360_v14  ;;  %v359_v0 = vsel %vm353_vm8, %v270_v44, 0.0  ;;  %v339_v60 = vmul.f32 %v1037_v1, %v319_v15  ;;  %v420_v24 = vmul.f32 %v409_v33, %v400_v9  ;;  %v738_v9 = vld [vmem:[%s1159_s7] ss:$0 sm:$0xff] }
 0x26b   :  { %v434_v5 = vsel %vm427_vm11, %v425_v21, 0.0  ;;  %v426_v8 = vadd.f32 %v422_v20, %v386_v61  ;;  %v399_v63 = vsel %vm393_vm10, %v270_v44, 0.0  ;;  %v379_v16 = vmul.f32 %v1047_v13, %v359_v0 }
 0x26c   :  { %435 = vadd.xlane.f32.xlu0 %v434_v5  ;;  %v384_v25 = vadd.f32 %v380_v23, %v344_v22  ;;  %v343_v26 = vadd.f32 %v339_v60, %v299_v62  ;;  %v419_v7 = vmul.f32 %v1051_v17, %v399_v63 }
 0x26d   :  { %v437_v11 = vsel %vm427_vm11, %v426_v8, 0.0 }
 0x26e   :  { %v424_v27 = vadd.f32 %v420_v24, %v384_v25  ;;  %v383_v28 = vadd.f32 %v379_v16, %v343_v26 }
 0x270   :  { %v431_v30 = vsel %vm427_vm11, %v424_v27, 0.0  ;;  %438 = vadd.xlane.f32.xlu0 %v437_v11  ;;  %v423_v1 = vadd.f32 %v419_v7, %v383_v28 }
 0x271   :  { %432 = vadd.xlane.f32.xlu1 %v431_v30 }
 0x272   :  { %v428_v31 = vsel %vm427_vm11, %v423_v1, 0.0 }
 0x274   :  { %429 = vadd.xlane.f32.xlu0 %v428_v31 }
 0x282   :  { %455 = vrot.lane.b32.xlu1 %v1007_v41, %s887_s0 }
 0x28a   :  { %503 = vrot.lane.b32.xlu0 %v1005_v40, %s887_s0 }
 0x2f9   :  { %v436_v13 = vpop.xlane.xlu0 %435 }
 0x2fa   :  { %v442_v18 = vmax.f32 %v436_v13, 1e-30 }
 0x2fc   :  { %841 = vrcp.f32 %v442_v18 }
 0x2fd   :  { %v439_v29 = vpop.xlane.xlu0 %438 }
 0x2fe   :  { %v433_v32 = vpop.xlane.xlu1 %432  ;;  %v443_v33 = vmax.f32 %v439_v29, 1e-30 }
 0x2ff   :  { %v441_v17 = vmax.f32 %v433_v32, 1e-30 }
 0x300   :  { %843 = vrcp.f32 %v443_v33 }
 0x301   :  { %v430_v34 = vpop.xlane.xlu0 %429  ;;  %845 = vrcp.f32 %v441_v17 }
 0x302   :  { %v456_v35 = vpop.permute.xlu1 %455  ;;  %v440_v36 = vmax.f32 %v430_v34, 1e-30 }
 0x303   :  { %782 = vmatpush3.bf16.msra.mxu1 %v456_v35 }
 0x304   :  { %847 = vrcp.f32 %v440_v36  ;;  %793 = vmatprep.subr.bf16.mxu1 %v827_v48 }
 0x305   :  { %v504_v37 = vpop.permute.xlu0 %503 }
 0x306   :  { %788 = vmatpush3.bf16.msra.mxu0 %v504_v37  ;;  %v842_v38 = vpop.eup %841 }
 0x307   :  { %v450_v39 = vmul.f32 %v842_v38, %v425_v21 }
 0x30a   :  { %v844_v41 = vpop.eup %843 }
 0x30b   :  { %v451_v40 = vmul.f32 %v844_v41, %v426_v8  ;;  %v846_v42 = vpop.eup %845 }
 0x30c   :  { %v449_v45 = vmul.f32 %v846_v42, %v424_v27 }
 0x30d   :  { %v453_v43 = vpack.c.bf16 %v451_v40, %v450_v39 }
 0x30e   :  { %v848_v44 = vpop.eup %847 }
 0x30f   :  { %v448_v46 = vmul.f32 %v848_v44, %v423_v1  ;;  %790 = vmatmul.mubr.msk.bf16.vlgmr.msra.gmra.mrb[8].mxu0 %vm427_vm11, %v453_v43 }
 0x311   :  { %v452_v47 = vpack.c.bf16 %v449_v45, %v448_v46  ;;  %v743_v46 = vld [vmem:[%s1160_s8] ss:$0 sm:$0xff]  ;;  %s718_s8 = sshll.u32 %s888_s24, 4  ;;  %s719_s8 = int_to_ptr.vmem [resolvable:$true] %s718_s8 }
 0x312   :  { %p862_p1 = scmp.lt.s32.totalorder %s719_s8, %s719_s8 }
 0x313   :  { %784 = vmatmul.mubr.msk.bf16.vlgmr.msra.gmra.mrb[4].mxu1 %vm427_vm11, %v452_v47 }
 0x314   :  { %794 = vmatpush3.bf16.msra.mxu1 %v827_v48 }
 0x315   :  { %795 = vmatprep.subr.bf16.mxu1 %v828_v49 }
 0x318   :  { %796 = vmatpush3.bf16.msra.mxu1 %v828_v49  ;;  %v744_v49 = vld [vmem:[%s1161_s9] ss:$0 sm:$0xff]  ;;  %s857_s9 = scalar_lea.vmem %s719_s8, 512 }
 0x319   :  { %p858_p0 = scmp.ne.s32.totalorder %s719_s8, %s857_s9  ;;  %p863_p2 = scmp.lt.s32.totalorder %s857_s9, %s857_s9 }
 0x31b   :  { %p864_p3 = por %p863_p2, %p862_p1 }
 0x31d   :  { %p865_p4 = pnand %p864_p3, %p858_p0 }
 0x3e2   :  { %v543_v50 = vpop.f32.mrb[8].mxu0 }
 0x3e3   :  { %v791_v51 = vpop.f32.mrb[9].mxu0 }
 0x3e4   :  { %v546_v52 = vpop.f32.mrb[10].mxu0 }
 0x3e5   :  { %v551_v53 = vpack.c.bf16 %v546_v52, %v543_v50  ;;  %v792_v54 = vpop.f32.mrb[11].mxu0 }
 0x3e6   :  { %v495_v55 = vpop.f32.mrb[4].mxu1 }
 0x3e7   :  { %v785_v56 = vpop.f32.mrb[5].mxu1 }
 0x3e8   :  { %v498_v57 = vpop.f32.mrb[6].mxu1 }
 0x3e9   :  { %v550_v58 = vpack.c.bf16 %v498_v57, %v495_v55  ;;  %v786_v59 = vpop.f32.mrb[7].mxu1 }
 0x3eb   :  { %797 = vmatprep.mubr.msk.bf16.mxu1 %vm66_vm0, %v550_v58 }
 0x3ec   :  { %798 = vmatmul.mubr.msk.bf16.vlgmr.msra.gmra.mrb[8].mxu1 %vm66_vm0, %v551_v53 }
 0x4bf   :  { %v799_v10 = vpop.f32.mrb[8].mxu1 }
 0x4c0   :  { %v615_v12 = vpop.f32.mrb[9].mxu1  ;;  %v624_v14 = vadd.f32 %v799_v10, %v738_v9 }
 0x4c1   :  { %v616_v19 = vadd.f32 %v738_v9, %v615_v12  ;;  %v800_v61 = vpop.f32.mrb[10].mxu1 }
 0x4c2   :  { %v618_v20 = vpop.f32.mrb[11].mxu1  ;;  %v627_v21 = vadd.f32 %v800_v61, %v738_v9  ;;  %v632_v0 = vadd.f32 %v624_v14, %v965_v4 }
 0x4c3   :  { %v619_v62 = vadd.f32 %v738_v9, %v618_v20  ;;  %v630_v22 = vadd.f32 %v616_v19, %v955_v2 }
 0x4c4   :  { %v633_v8 = vadd.f32 %v627_v21, %v972_v6  ;;  %v640_v60 = vsel %vm66_vm0, %v632_v0, 0.0 }
 0x4c5   :  { %v634_v23 = vsel %vm66_vm0, %v630_v22, 0.0  ;;  %v631_v15 = vadd.f32 %v619_v62, %v960_v3 }
 0x4c6   :  { %635 = vadd.xlane.f32.xlu1 %v634_v23  ;;  %v643_v24 = vsel %vm66_vm0, %v633_v8, 0.0 }
 0x4c7   :  { %v637_v5 = vsel %vm66_vm0, %v631_v15, 0.0 }
 0x4c8   :  { %638 = vadd.xlane.f32.xlu0 %v637_v5 }
 0x4ca   :  { %641 = vadd.xlane.f32.xlu1 %v640_v60 }
 0x4cc   :  { %644 = vadd.xlane.f32.xlu0 %v643_v24 }
 0x553   :  { %v636_v25 = vpop.xlane.xlu1 %635 }
 0x554   :  { %v647_v2 = vmul.f32 0.03125, %v636_v25 }
 0x555   :  { %v639_v63 = vpop.xlane.xlu0 %638 }
 0x556   :  { %v651_v26 = vsub.f32 %v630_v22, %v647_v2  ;;  %v648_v16 = vmul.f32 0.03125, %v639_v63 }
 0x557   :  { %v642_v3 = vpop.xlane.xlu1 %641 }
 0x558   :  { %v652_v27 = vsub.f32 %v631_v15, %v648_v16  ;;  %v649_v4 = vmul.f32 0.03125, %v642_v3  ;;  %v655_v11 = vmul.f32 %v651_v26, %v651_v26 }
 0x559   :  { %v645_v28 = vpop.xlane.xlu0 %644 }
 0x55a   :  { %v653_v7 = vsub.f32 %v632_v0, %v649_v4  ;;  %v650_v30 = vmul.f32 0.03125, %v645_v28  ;;  %v659_v6 = vsel %vm66_vm0, %v655_v11, 0.0  ;;  %v656_v1 = vmul.f32 %v652_v27, %v652_v27 }
 0x55b   :  { %660 = vadd.xlane.f32.xlu1 %v659_v6 }
 0x55c   :  { %v654_v31 = vsub.f32 %v633_v8, %v650_v30  ;;  %v662_v13 = vsel %vm66_vm0, %v656_v1, 0.0  ;;  %v657_v18 = vmul.f32 %v653_v7, %v653_v7 }
 0x55d   :  { %663 = vadd.xlane.f32.xlu0 %v662_v13 }
 0x55e   :  { %v665_v29 = vsel %vm66_vm0, %v657_v18, 0.0  ;;  %v658_v32 = vmul.f32 %v654_v31, %v654_v31 }
 0x55f   :  { %666 = vadd.xlane.f32.xlu1 %v665_v29 }
 0x560   :  { %v668_v33 = vsel %vm66_vm0, %v658_v32, 0.0 }
 0x561   :  { %669 = vadd.xlane.f32.xlu0 %v668_v33 }
 0x5e8   :  { %v661_v17 = vpop.xlane.xlu1 %660 }
 0x5e9   :  { %v671_v34 = vmul.f32 0.03125, %v661_v17 }
 0x5ea   :  { %v664_v35 = vpop.xlane.xlu0 %663 }
 0x5eb   :  { %v675_v36 = vadd.f32 1e-12, %v671_v34  ;;  %v672_v37 = vmul.f32 0.03125, %v664_v35 }
 0x5ec   :  { %v667_v38 = vpop.xlane.xlu1 %666 }
 0x5ed   :  { %849 = vrsqrt.f32 %v675_v36  ;;  %v676_v41 = vadd.f32 1e-12, %v672_v37  ;;  %v673_v39 = vmul.f32 0.03125, %v667_v38 }
 0x5ee   :  { %v670_v40 = vpop.xlane.xlu0 %669 }
 0x5ef   :  { %851 = vrsqrt.f32 %v676_v41  ;;  %v677_v42 = vadd.f32 1e-12, %v673_v39  ;;  %v674_v43 = vmul.f32 0.03125, %v670_v40 }
 0x5f1   :  { %853 = vrsqrt.f32 %v677_v42  ;;  %v678_v44 = vadd.f32 1e-12, %v674_v43 }
 0x5f3   :  { %855 = vrsqrt.f32 %v678_v44 }
 0x5f7   :  { %v850_v45 = vpop.eup %849 }
 0x5f8   :  { %v683_v47 = vmul.f32 %v850_v45, %v651_v26 }
 0x5f9   :  { %v852_v48 = vpop.eup %851 }
 0x5fa   :  { %v694_v50 = vmul.f32 %v743_v46, %v683_v47  ;;  %v684_v51 = vmul.f32 %v852_v48, %v652_v27 }
 0x5fb   :  { %v854_v52 = vpop.eup %853 }
 0x5fc   :  { %v705_v53 = vadd.f32 %v744_v49, %v694_v50  ;;  %v695_v54 = vmul.f32 %v743_v46, %v684_v51  ;;  %v685_v55 = vmul.f32 %v854_v52, %v653_v7 }
 0x5fd   :  { %v856_v56 = vpop.eup %855 }
 0x5fe   :  { %709 = vst.msk [vmem:[#allocation2] sm:$0xff] %vm66_vm0, %v705_v53  ;;  %v706_v57 = vadd.f32 %v744_v49, %v695_v54  ;;  %v696_v58 = vmul.f32 %v743_v46, %v685_v55  ;;  %v686_v59 = vmul.f32 %v856_v56, %v654_v31 }
 0x600   :  { %710 = vst.msk [vmem:[#allocation2 + $0x8] sm:$0xff] %vm66_vm0, %v706_v57  ;;  %v707_v9 = vadd.f32 %v744_v49, %v696_v58  ;;  %v697_v10 = vmul.f32 %v743_v46, %v686_v59 }
 0x602   :  { %711 = vst.msk [vmem:[#allocation2 + $0x10] sm:$0xff] %vm66_vm0, %v707_v9  ;;  %v708_v12 = vadd.f32 %v744_v49, %v697_v10 }
 0x604   :  { %712 = vst.msk [vmem:[#allocation2 + $0x18] sm:$0xff] %vm66_vm0, %v708_v12 }
 0x605   :  { %868 = shalt.err (!%p865_p4)
}
 0x606   :  { %s869_s27 = scalar_lea.hbm %s1162_s10, 512 }
 0x607   :  { %p870_p5 = scmp.ne.s32.totalorder %s1162_s10, %s869_s27  ;;  %p873_p6 = scmp.lt.u32.totalorder %s869_s27, %s1162_s10 }
 0x609   :  { %p875_p7 = pnand %p873_p6, %p870_p5 }
 0x60b   :  { %878 = shalt.err (!%p875_p7)
}
 0x60c   :  { %s889_s12 = smov 128   ;;  %s890_s3 = smov 8  }
 0x60d   :  { %724 = dma.vmem_to_hbm [thread:$0]  %s719_s8, 512, %s1162_s10, [#allocation3], %s889_s12, %s889_s12, %s890_s3  }
 0x60e   :  { %879 = dma.done.wait [#allocation3], 512  }
 0x60f   :  { %880 = vsyncadd [#allocation3], 4294966784 }
 0x610   :  { %728 = vsyncpa [#allocation3], 1 }

</bundles_post_ra>
